<compile_context>
chip_gen: v7x
topology: tpu7x:2x2x1
jax: 0.10.0
libtpu: 0.0.40
codegen_flags: <defaults>
</compile_context>

<pallas_src>
import numpy as np
import jax
import jax.numpy as jnp
from jax.experimental import pallas as pl
from jax.experimental.pallas import tpu as pltpu


def _round_up(x, m):
    return (x + m - 1) // m * m


def get_expk(N, dtype=jnp.float32):
    """Mirror of discrete_spectral_transform.get_expk: stack([cos, -sin], -1), (N, 2)."""
    k = jnp.arange(N, dtype=jnp.float32)
    theta = k * (np.pi / (2.0 * N))
    return jnp.stack([jnp.cos(theta), -jnp.sin(theta)], axis=-1).astype(dtype)


_BASIS_CACHE = {}


def _cosT_basis(N, n_pad, k_pad, compute_dtype):
    """Ct[n, k] = cos(pi * k * (2n+1) / (2N)), zero-padded to (n_pad, k_pad).

    Built once per (N, dtype) on host in float64 with exact integer range
    reduction (phase index = (k*(2n+1)) mod 4N), then cached as a device array.
    """
    key = (N, n_pad, k_pad, np.dtype(compute_dtype).name)
    hit = _BASIS_CACHE.get(key)
    if hit is not None:
        return hit
    n = np.arange(N, dtype=np.int64)
    k = np.arange(N, dtype=np.int64)
    m = np.outer(2 * n + 1, k) % (4 * N)                    # exact integer phase
    ct = np.cos(np.pi * m.astype(np.float64) / (2.0 * N))   # (N, N), f64
    full = np.zeros((n_pad, k_pad), dtype=np.float32)
    full[:N, :N] = ct.astype(np.float32)
    dev = jnp.asarray(full).astype(compute_dtype)
    _BASIS_CACHE[key] = dev
    return dev


def _dct_kernel(x_ref, ct_ref, o_ref):
    # x tile kept in its HBM dtype; cast to the MXU operand dtype in-kernel
    # (VPU cast hides under the matmul). Accumulation is always f32.
    x = x_ref[...].astype(ct_ref.dtype)
    o_ref[...] = jnp.dot(
        x, ct_ref[...], preferred_element_type=jnp.float32
    ).astype(o_ref.dtype)


def _tpu_hw():
    """Returns (physical VMEM bytes per core, has-2-TensorCores-per-chip)."""
    vmem = 64 << 20                         # conservative default if query fails
    try:
        info = pltpu.get_tpu_info()
        vmem = int(getattr(info, "vmem_capacity_bytes", vmem))
    except Exception:
        pass
    two_tc = vmem <= (64 << 20)             # v7x-class parts: 64 MiB per TC
    try:
        kind = jax.devices()[0].device_kind.lower()
        if ("v7" in kind) or ("v4" in kind) or ("v5p" in kind):
            two_tc = True
    except Exception:
        pass
    return vmem, two_tc


def _choose_tiles(R, n_pad, k_pad, x_isz, b_isz, out_isz, budget, two_tc, sublane):
    """Pick (row tile, output-column tile) against an explicit VMEM budget."""
    # Keep the whole basis slab resident unless its double buffer blows half the
    # budget; otherwise fall back to a 512/256-wide slab (fills 256-wide MXUs).
    if 2 * n_pad * k_pad * b_isz <= budget // 2:
        tk = k_pad
    else:
        tk = 128
        for cand in (512, 256):
            if k_pad % cand == 0:
                tk = cand
                break
    # Fill the remaining (double-buffered) budget with rows.
    rem = max(budget - 2 * n_pad * tk * b_isz, 0)
    per_row = 2 * (n_pad * x_isz + tk * out_isz)
    tr_cap = 2048 if tk == k_pad else 1024
    tr = max(sublane, min(tr_cap, rem // per_row // sublane * sublane))
    # Megacore: keep >= 2 row steps only on 2-TC parts and only when each core
    # still gets an MXU-filling (>= 256 row) tile.
    if two_tc:
        half = _round_up(pl.cdiv(_round_up(R, sublane), 2), sublane)
        if half >= 256:
            tr = min(tr, half)
    tr = min(tr, _round_up(R, sublane))
    return tr, tk


def dct_pallas(x, expk=None, *, use_bf16_operands=True):
    """Unnormalized DCT-II along the last dim of x (arbitrary leading dims)."""
    # TODO(synk): a user-supplied *non-standard* expk is ignored; the basis is
    # rebuilt exactly from the trailing size (identical to the module, which
    # always constructs the standard expk via get_expk).
    orig_shape = x.shape
    N = x.shape[-1]
    out_dtype = x.dtype

    if x.dtype == jnp.bfloat16 or use_bf16_operands:
        compute_dtype, b_isz = jnp.bfloat16, 2
    else:
        compute_dtype, b_isz = jnp.float32, 4
    x_isz = int(np.dtype(x.dtype).itemsize)
    out_isz = int(np.dtype(out_dtype).itemsize)
    sublane = 16 if (b_isz == 2 or x_isz == 2) else 8

    xb = x.reshape(-1, N)
    R = xb.shape[0]

    n_pad = _round_up(N, 128)               # lane-dense contraction dim
    k_pad = _round_up(N, 128)               # lane-dense output stores

    vmem_phys, two_tc = _tpu_hw()
    budget = min(int(vmem_phys * 0.45), 64 << 20)
    tr, tk = _choose_tiles(R, n_pad, k_pad, x_isz, b_isz, out_isz,
                           budget, two_tc, sublane)
    r_pad = _round_up(R, tr)
    if r_pad > R or n_pad > N:
        xb = jnp.pad(xb, ((0, r_pad - R), (0, n_pad - N)))   # zeros, sliced off below

    ct = _cosT_basis(N, n_pad, k_pad, compute_dtype)          # (n_pad, k_pad)

    num_r = r_pad // tr
    num_k = k_pad // tk

    # Grid order: make the operand that is re-fetched across the inner axis the
    # cheaper one (the other operand's block index stays constant -> no re-DMA).
    basis_refetch = (num_r if num_k > 1 else 1) * n_pad * k_pad * b_isz
    x_refetch = (num_k if num_r > 1 else 1) * r_pad * n_pad * x_isz
    swap = (num_k > 1) and (basis_refetch > x_refetch)
    if swap:
        grid = (num_k, num_r)
        x_map = lambda k, r: (r, 0)
        b_map = lambda k, r: (0, k)
        o_map = lambda k, r: (r, k)
        in_bytes = x_refetch + n_pad * k_pad * b_isz
    else:
        grid = (num_r, num_k)
        x_map = lambda r, k: (r, 0)
        b_map = lambda r, k: (0, k)
        o_map = lambda r, k: (r, k)
        in_bytes = basis_refetch + r_pad * n_pad * x_isz

    # Double-buffered working set per step + headroom; generation-aware cap
    # (never ask for all of v7x's 64 MiB physical VMEM).
    needed = 2 * (tr * n_pad * x_isz + n_pad * tk * b_isz + tr * tk * out_isz)
    cap = (48 << 20) if vmem_phys <= (64 << 20) else (100 << 20)
    vmem_limit = int(min(cap, max(32 << 20, needed + (needed >> 2) + (4 << 20))))

    cost = pl.CostEstimate(
        flops=int(2 * r_pad * n_pad * k_pad),
        transcendentals=0,
        bytes_accessed=int(in_bytes + r_pad * k_pad * out_isz),
    )

    # TODO(synk): single-buffering the constant basis (pl.Buffered(1)) when
    # num_k == 1 was skipped for lowering robustness; its second buffer is
    # already accounted for in the VMEM budget above.
    out = pl.pallas_call(
        _dct_kernel,
        out_shape=jax.ShapeDtypeStruct((r_pad, k_pad), out_dtype),
        grid_spec=pl.GridSpec(
            grid=grid,
            in_specs=[
                pl.BlockSpec((tr, n_pad), x_map),   # rows
                pl.BlockSpec((n_pad, tk), b_map),   # cosine basis slab
            ],
            out_specs=pl.BlockSpec((tr, tk), o_map),
        ),
        compiler_params=pltpu.CompilerParams(
            dimension_semantics=("parallel", "parallel"),
            vmem_limit_bytes=vmem_limit,
        ),
        cost_estimate=cost,
    )(xb, ct)

    return out[:R, :N].reshape(orig_shape).astype(out_dtype)


class DCT:
    """JAX/Pallas port of the PyTorch DCT module (dreamplace/ops/dct/dct.py)."""

    def __init__(self, expk=None, algorithm='N', use_bf16_operands=True):
        self.expk = expk
        # 'N' vs '2N' select different FFT factorizations of the same DCT-II in
        # the C++/HIP op; the direct cosine-matmul path is identical for both.
        self.algorithm = algorithm
        self.use_bf16_operands = use_bf16_operands

    def __call__(self, x):
        if self.expk is None or self.expk.shape[-2] != x.shape[-1]:
            self.expk = get_expk(x.shape[-1], x.dtype)
        return dct_pallas(x, self.expk, use_bf16_operands=self.use_bf16_operands)


if __name__ == "__main__":
    key = jax.random.PRNGKey(0)
    x = jax.random.normal(key, (2, 4, 16, 16), dtype=jnp.float32)

    # Reference of the documented math in float64:
    #   y[..., k] = sum_n x[..., n] * cos(pi * k * (2n+1) / (2N))
    N = x.shape[-1]
    xn = np.asarray(x, dtype=np.float64)
    n = np.arange(N, dtype=np.float64)
    k = np.arange(N, dtype=np.float64)
    C = np.cos(np.pi * np.outer(k, 2.0 * n + 1.0) / (2.0 * N))   # (K, N)
    y_ref = np.einsum("...n,kn->...k", xn, C)

    # f32 MXU-operand path: tight tolerance.
    y32 = jax.block_until_ready(dct_pallas(x, use_bf16_operands=False))
    assert y32.shape == x.shape and y32.dtype == x.dtype
    np.testing.assert_allclose(np.asarray(y32, dtype=np.float64), y_ref,
                               rtol=1e-4, atol=1e-4)

    # Default path (bf16 MXU operands, f32 accumulation): bf16-level tolerance.
    mod = DCT()
    y16 = jax.block_until_ready(mod(x))
    assert y16.shape == x.shape and y16.dtype == x.dtype
    np.testing.assert_allclose(np.asarray(y16, dtype=np.float64), y_ref,
                               rtol=5e-2, atol=1e-1)

    print("KERNEL_OK")
</pallas_src>

<mosaic_0001>
module attributes {stable_mosaic.version = 11 : i64} {
  func.func @_dct_kernel(%arg0: i32, %arg1: i32, %arg2: memref<128x128xf32, #tpu.memory_space<vmem>>, %arg3: memref<128x128xf32, #tpu.memory_space<vmem>>, %arg4: memref<128x128xf32, #tpu.memory_space<vmem>>) attributes {dimension_semantics = [#tpu.dimension_semantics<parallel>, #tpu.dimension_semantics<parallel>], iteration_bounds = array<i64: 1, 1>, scalar_prefetch = 0 : i64, scratch_operands = 0 : i64, tpu.core_type = #tpu.core_type<tc>, window_params = [{transform_indices = @transform_0, window_bounds = array<i64: 128, 128>}, {transform_indices = @transform_1, window_bounds = array<i64: 128, 128>}, {transform_indices = @transform_2, window_bounds = array<i64: 128, 128>}]} {
    %c0 = arith.constant 0 : index
    %c0_0 = arith.constant 0 : index
    %0 = vector.load %arg2[%c0, %c0_0] : memref<128x128xf32, #tpu.memory_space<vmem>>, vector<128x128xf32>
    %c0_1 = arith.constant 0 : index
    %c0_2 = arith.constant 0 : index
    %1 = vector.load %arg3[%c0_1, %c0_2] : memref<128x128xf32, #tpu.memory_space<vmem>>, vector<128x128xf32>
    %cst = arith.constant dense<0.000000e+00> : vector<128x128xf32>
    %2 = tpu.matmul %0, %1, %cst {dimension_numbers = #tpu.dot_dimension_numbers<[1], [0], [0], [1], [0, 0, 1, 1], [], []>} : vector<128x128xf32>, vector<128x128xf32>, vector<128x128xf32> -> vector<128x128xf32>
    %c0_3 = arith.constant 0 : index
    %c0_4 = arith.constant 0 : index
    %3 = vector.load %arg4[%c0_3, %c0_4] : memref<128x128xf32, #tpu.memory_space<vmem>>, vector<128x128xf32>
    tpu.vector_store %arg4[%c0_3, %c0_4], %2 {strides = array<i32>} : memref<128x128xf32, #tpu.memory_space<vmem>>, vector<128x128xf32>,
    return
  }
  func.func @transform_0(%arg0: i32, %arg1: i32) -> (i32, i32) {
    %c0_i32 = arith.constant 0 : i32
    %c0_i32_0 = arith.constant 0 : i32
    return %arg0, %c0_i32 : i32, i32
  }
  func.func @transform_1(%arg0: i32, %arg1: i32) -> (i32, i32) {
    %c0_i32 = arith.constant 0 : i32
    %c0_i32_0 = arith.constant 0 : i32
    return %c0_i32, %arg1 : i32, i32
  }
  func.func @transform_2(%arg0: i32, %arg1: i32) -> (i32, i32) {
    %c0_i32 = arith.constant 0 : i32
    return %arg0, %arg1 : i32, i32
  }
}

</mosaic_0001>

<bundles_post_ra>
// kernel: tpu_custom_call.1
= control target key start
LH: loop header
LB: loop body
LE: loop exit
PB: predicated region body
PF: predicated region fallthrough
CT: control target
= control target key end

     0   :  { %7 = vsyncpa [#allocation3], 0  ;;  %s529_s0 = inlined_call_operand.hbm [shape: f32[128,128], index: 0, kind: input, shape index: {}]   ;;  %s530_s1 = inlined_call_operand.hbm [shape: f32[128,128], index: 1, kind: input, shape index: {}]   ;;  %s531_s2 = inlined_call_operand.hbm [shape: f32[128,128], index: 2, kind: output, shape index: {}]  }
   0x1   :  { %8 = vsyncpa [#allocation6], 0 }
   0x2   :  { %9 = vsyncpa [#allocation4], 0  ;;  %s464_s9 = smov [#allocation2]   ;;  %s392_s13 = scalar_lea.hbm %s529_s0, 2048 }
   0x3   :  { %s15_s10 = sshll.u32 %s464_s9, 4  ;;  %p393_p0 = scmp.ne.s32.totalorder %s529_s0, %s392_s13  ;;  %s16_s10 = int_to_ptr.vmem [resolvable:$true] %s15_s10 }
   0x4   :  { %p396_p1 = scmp.lt.u32.totalorder %s392_s13, %s529_s0 }
   0x6   :  { %p398_p2 = pnand %p396_p1, %p393_p0 }
   0x8   :  { %401 = shalt.err (!%p398_p2)
}
   0x9   :  { %s402_s18 = scalar_lea.vmem %s16_s10, 2048  ;;  %p407_p4 = scmp.lt.s32.totalorder %s16_s10, %s16_s10 }
   0xa   :  { %p403_p3 = scmp.ne.s32.totalorder %s16_s10, %s402_s18  ;;  %p408_p5 = scmp.lt.s32.totalorder %s402_s18, %s402_s18 }
   0xc   :  { %p409_p6 = por %p408_p5, %p407_p4 }
   0xe   :  { %p410_p7 = pnand %p409_p6, %p403_p3 }
  0x10   :  { %413 = shalt.err (!%p410_p7)
}
  0x11   :  { %s465_s19 = smov 128   ;;  %s466_s20 = smov 8  }
  0x12   :  { %21 = dma.hbm_to_vmem [thread:$0]  %s529_s0, 2048, %s16_s10, [#allocation3], %s465_s19, %s465_s19, %s466_s20  }
  0x13   :  { %s467_s23 = smov [#allocation5]   ;;  %s414_s27 = scalar_lea.hbm %s530_s1, 2048 }
  0x14   :  { %s27_s24 = sshll.u32 %s467_s23, 4  ;;  %p415_p8 = scmp.ne.s32.totalorder %s530_s1, %s414_s27  ;;  %s28_s24 = int_to_ptr.vmem [resolvable:$true] %s27_s24 }
  0x15   :  { %p418_p9 = scmp.lt.u32.totalorder %s414_s27, %s530_s1 }
  0x17   :  { %p420_p10 = pnand %p418_p9, %p415_p8 }
  0x19   :  { %423 = shalt.err (!%p420_p10)
}
  0x1a   :  { %s424_s4 = scalar_lea.vmem %s28_s24, 2048  ;;  %p429_p12 = scmp.lt.s32.totalorder %s28_s24, %s28_s24 }
  0x1b   :  { %p425_p11 = scmp.ne.s32.totalorder %s28_s24, %s424_s4  ;;  %p430_p13 = scmp.lt.s32.totalorder %s424_s4, %s424_s4 }
  0x1d   :  { %p431_p0 = por %p430_p13, %p429_p12 }
  0x1f   :  { %p432_p1 = pnand %p431_p0, %p425_p11 }
  0x21   :  { %435 = shalt.err (!%p432_p1)
}
  0x22   :  { %33 = dma.hbm_to_vmem [thread:$0]  %s530_s1, 2048, %s28_s24, [#allocation6], %s465_s19, %s465_s19, %s466_s20  }
  0x23   :  { %458 = dma.done.wait [#allocation3], 2048  }
  0x24   :  { %459 = vsyncadd [#allocation3], 4294965248 }
  0x25   :  { %460 = dma.done.wait [#allocation6], 2048  }
  0x26   :  { %461 = vsyncadd [#allocation6], 4294965248  ;;  %v56_v0 = vld [vmem:[#allocation5] sm:$0xff]  ;;  %v57_v1 = vld [vmem:[#allocation5 + $0x8] sm:$0xff]  ;;  %s468_s1 = smov [#allocation7]  }
  0x27   :  { %v58_v2 = vld [vmem:[#allocation5 + $0x10] sm:$0xff]  ;;  %v339_v3 = vpack.c.bf16 %v57_v1, %v56_v0  ;;  %v59_v4 = vld [vmem:[#allocation5 + $0x18] sm:$0xff]  ;;  %v60_v6 = vld [vmem:[#allocation5 + $0x20] sm:$0xff]  ;;  %s238_s6 = sshll.u32 %s468_s1, 4  ;;  %s239_s6 = int_to_ptr.vmem [resolvable:$true] %s238_s6 }
  0x28   :  { %v343_v5 = vpack.c.bf16 %v59_v4, %v58_v2  ;;  %v61_v7 = vld [vmem:[#allocation5 + $0x28] sm:$0xff]  ;;  %v40_v9 = vld [vmem:[#allocation2] sm:$0xff]  ;;  %v62_v11 = vld [vmem:[#allocation5 + $0x30] sm:$0xff]  ;;  %s436_s7 = scalar_lea.vmem %s239_s6, 2048  ;;  %p441_p3 = scmp.lt.s32.totalorder %s239_s6, %s239_s6 }
  0x29   :  { %340 = vmatprep.subr.bf16.mxu0 %v339_v3  ;;  %371 = vmatprep.subr.bf16.mxu1 %v339_v3  ;;  %v347_v8 = vpack.c.bf16 %v61_v7, %v60_v6  ;;  %v48_v10 = vld [vmem:[#allocation2 + $0x40] sm:$0xff]  ;;  %v63_v12 = vld [vmem:[#allocation5 + $0x38] sm:$0xff]  ;;  %v65_v15 = vld [vmem:[#allocation5 + $0x48] sm:$0xff]  ;;  %p437_p2 = scmp.ne.s32.totalorder %s239_s6, %s436_s7  ;;  %p442_p4 = scmp.lt.s32.totalorder %s436_s7, %s436_s7 }
  0x2a   :  { %342 = vmatpush3.bf16.msra.mxu0 %v339_v3  ;;  %379 = vmatpush3.bf16.msra.mxu1 %v339_v3  ;;  %v351_v13 = vpack.c.bf16 %v63_v12, %v62_v11  ;;  %v64_v14 = vld [vmem:[#allocation5 + $0x40] sm:$0xff]  ;;  %v66_v17 = vld [vmem:[#allocation5 + $0x50] sm:$0xff]  ;;  %v67_v18 = vld [vmem:[#allocation5 + $0x58] sm:$0xff] }
  0x2b   :  { %344 = vmatprep.subr.bf16.mxu0 %v343_v5  ;;  %372 = vmatprep.subr.bf16.mxu1 %v343_v5  ;;  %v355_v16 = vpack.c.bf16 %v65_v15, %v64_v14  ;;  %v359_v19 = vpack.c.bf16 %v67_v18, %v66_v17  ;;  %v68_v20 = vld [vmem:[#allocation5 + $0x60] sm:$0xff]  ;;  %v69_v21 = vld [vmem:[#allocation5 + $0x68] sm:$0xff]  ;;  %v70_v23 = vld [vmem:[#allocation5 + $0x70] sm:$0xff]  ;;  %p443_p5 = por %p442_p4, %p441_p3 }
  0x2c   :  { %315 = vmatprep.mubr.f32.mxu0 %v40_v9  ;;  %327 = vmatprep.mubr.f32.mxu1 %v48_v10  ;;  %v363_v22 = vpack.c.bf16 %v69_v21, %v68_v20  ;;  %v71_v24 = vld [vmem:[#allocation5 + $0x78] sm:$0xff]  ;;  %v41_v26 = vld [vmem:[#allocation2 + $0x8] sm:$0xff]  ;;  %v42_v28 = vld [vmem:[#allocation2 + $0x10] sm:$0xff] }
  0x2d   :  { %v367_v25 = vpack.c.bf16 %v71_v24, %v70_v23  ;;  %v49_v27 = vld [vmem:[#allocation2 + $0x48] sm:$0xff]  ;;  %v50_v29 = vld [vmem:[#allocation2 + $0x50] sm:$0xff]  ;;  %v43_v30 = vld [vmem:[#allocation2 + $0x18] sm:$0xff]  ;;  %p444_p6 = pnand %p443_p5, %p437_p2 }
  0x2e   :  { %346 = vmatpush3.bf16.msra.mxu0 %v343_v5  ;;  %380 = vmatpush3.bf16.msra.mxu1 %v343_v5  ;;  %v51_v31 = vld [vmem:[#allocation2 + $0x58] sm:$0xff]  ;;  %v44_v32 = vld [vmem:[#allocation2 + $0x20] sm:$0xff]  ;;  %v45_v34 = vld [vmem:[#allocation2 + $0x28] sm:$0xff] }
  0x2f   :  { %348 = vmatprep.subr.bf16.mxu0 %v347_v8  ;;  %373 = vmatprep.subr.bf16.mxu1 %v347_v8  ;;  %v52_v33 = vld [vmem:[#allocation2 + $0x60] sm:$0xff]  ;;  %v53_v35 = vld [vmem:[#allocation2 + $0x68] sm:$0xff]  ;;  %v46_v36 = vld [vmem:[#allocation2 + $0x30] sm:$0xff] }
  0x30   :  { %v54_v37 = vld [vmem:[#allocation2 + $0x70] sm:$0xff]  ;;  %v47_v38 = vld [vmem:[#allocation2 + $0x38] sm:$0xff] }
  0x31   :  { %v55_v39 = vld [vmem:[#allocation2 + $0x78] sm:$0xff] }
  0x32   :  { %350 = vmatpush3.bf16.msra.mxu0 %v347_v8  ;;  %381 = vmatpush3.bf16.msra.mxu1 %v347_v8 }
  0x33   :  { %352 = vmatprep.subr.bf16.mxu0 %v351_v13  ;;  %374 = vmatprep.subr.bf16.mxu1 %v351_v13 }
  0x36   :  { %354 = vmatpush3.bf16.msra.mxu0 %v351_v13  ;;  %382 = vmatpush3.bf16.msra.mxu1 %v351_v13 }
  0x37   :  { %356 = vmatprep.subr.bf16.mxu0 %v355_v16  ;;  %375 = vmatprep.subr.bf16.mxu1 %v355_v16 }
  0x3a   :  { %358 = vmatpush3.bf16.msra.mxu0 %v355_v16  ;;  %383 = vmatpush3.bf16.msra.mxu1 %v355_v16 }
  0x3b   :  { %360 = vmatprep.subr.bf16.mxu0 %v359_v19  ;;  %376 = vmatprep.subr.bf16.mxu1 %v359_v19 }
  0x3e   :  { %362 = vmatpush3.bf16.msra.mxu0 %v359_v19  ;;  %384 = vmatpush3.bf16.msra.mxu1 %v359_v19 }
  0x3f   :  { %364 = vmatprep.subr.bf16.mxu0 %v363_v22  ;;  %377 = vmatprep.subr.bf16.mxu1 %v363_v22 }
  0x42   :  { %366 = vmatpush3.bf16.msra.mxu0 %v363_v22  ;;  %385 = vmatpush3.bf16.msra.mxu1 %v363_v22 }
  0x43   :  { %368 = vmatprep.subr.bf16.mxu0 %v367_v25  ;;  %378 = vmatprep.subr.bf16.mxu1 %v367_v25 }
  0x46   :  { %370 = vmatpush3.bf16.msra.mxu0 %v367_v25  ;;  %386 = vmatpush3.bf16.msra.mxu1 %v367_v25 }
  0x49   :  { %316 = vmatmul.mubr.f32.vlgmr.msra.gmra.mrb[0].mxu0 %v41_v26  ;;  %328 = vmatmul.mubr.f32.vlgmr.msra.gmra.mrb[0].mxu1 %v49_v27 }
  0x4a   :  { %318 = vmatprep.mubr.f32.mxu0 %v42_v28  ;;  %330 = vmatprep.mubr.f32.mxu1 %v50_v29 }
  0x4d   :  { %319 = vmatmul.mubr.f32.gmra.mrb[2].mxu0 %v43_v30  ;;  %331 = vmatmul.mubr.f32.gmra.mrb[2].mxu1 %v51_v31 }
  0x4e   :  { %321 = vmatprep.mubr.f32.mxu0 %v44_v32  ;;  %333 = vmatprep.mubr.f32.mxu1 %v52_v33 }
  0x51   :  { %322 = vmatmul.mubr.f32.gmra.mrb[4].mxu0 %v45_v34  ;;  %334 = vmatmul.mubr.f32.gmra.mrb[4].mxu1 %v53_v35 }
  0x52   :  { %324 = vmatprep.mubr.f32.mxu0 %v46_v36  ;;  %336 = vmatprep.mubr.f32.mxu1 %v54_v37 }
  0x55   :  { %325 = vmatmul.mubr.f32.gmra.mrb[6].mxu0 %v47_v38  ;;  %337 = vmatmul.mubr.f32.gmra.mrb[6].mxu1 %v55_v39 }
 0x11c   :  { %v317_v40 = vpop.f32.mrb[0].mxu0  ;;  %v329_v41 = vpop.f32.mrb[0].mxu1 }
 0x11d   :  { %218 = vst [vmem:[#allocation7 + $0x8] sm:$0xff] %v317_v40  ;;  %226 = vst [vmem:[#allocation7 + $0x48] sm:$0xff] %v329_v41  ;;  %v138_v42 = vpop.f32.mrb[1].mxu0  ;;  %v178_v43 = vpop.f32.mrb[1].mxu1 }
 0x11e   :  { %217 = vst [vmem:[#allocation7] sm:$0xff] %v138_v42  ;;  %225 = vst [vmem:[#allocation7 + $0x40] sm:$0xff] %v178_v43 }
 0x120   :  { %v320_v44 = vpop.f32.mrb[2].mxu0  ;;  %v332_v45 = vpop.f32.mrb[2].mxu1 }
 0x121   :  { %220 = vst [vmem:[#allocation7 + $0x18] sm:$0xff] %v320_v44  ;;  %228 = vst [vmem:[#allocation7 + $0x58] sm:$0xff] %v332_v45  ;;  %v148_v46 = vpop.f32.mrb[3].mxu0  ;;  %v188_v47 = vpop.f32.mrb[3].mxu1 }
 0x122   :  { %219 = vst [vmem:[#allocation7 + $0x10] sm:$0xff] %v148_v46  ;;  %227 = vst [vmem:[#allocation7 + $0x50] sm:$0xff] %v188_v47 }
 0x124   :  { %v323_v48 = vpop.f32.mrb[4].mxu0  ;;  %v335_v49 = vpop.f32.mrb[4].mxu1 }
 0x125   :  { %222 = vst [vmem:[#allocation7 + $0x28] sm:$0xff] %v323_v48  ;;  %230 = vst [vmem:[#allocation7 + $0x68] sm:$0xff] %v335_v49  ;;  %v158_v50 = vpop.f32.mrb[5].mxu0  ;;  %v198_v51 = vpop.f32.mrb[5].mxu1 }
 0x126   :  { %221 = vst [vmem:[#allocation7 + $0x20] sm:$0xff] %v158_v50  ;;  %229 = vst [vmem:[#allocation7 + $0x60] sm:$0xff] %v198_v51 }
 0x128   :  { %v326_v52 = vpop.f32.mrb[6].mxu0  ;;  %v338_v53 = vpop.f32.mrb[6].mxu1 }
 0x129   :  { %224 = vst [vmem:[#allocation7 + $0x38] sm:$0xff] %v326_v52  ;;  %232 = vst [vmem:[#allocation7 + $0x78] sm:$0xff] %v338_v53  ;;  %v168_v54 = vpop.f32.mrb[7].mxu0  ;;  %v208_v55 = vpop.f32.mrb[7].mxu1 }
 0x12a   :  { %223 = vst [vmem:[#allocation7 + $0x30] sm:$0xff] %v168_v54  ;;  %231 = vst [vmem:[#allocation7 + $0x70] sm:$0xff] %v208_v55 }
 0x12b   :  { %447 = shalt.err (!%p444_p6)
}
 0x12c   :  { %s448_s10 = scalar_lea.hbm %s531_s2, 2048 }
 0x12d   :  { %p449_p7 = scmp.ne.s32.totalorder %s531_s2, %s448_s10  ;;  %p452_p8 = scmp.lt.u32.totalorder %s448_s10, %s531_s2 }
 0x12f   :  { %p454_p9 = pnand %p452_p8, %p449_p7 }
 0x131   :  { %457 = shalt.err (!%p454_p9)
}
 0x132   :  { %244 = dma.vmem_to_hbm [thread:$0]  %s239_s6, 2048, %s531_s2, [#allocation4], %s465_s19, %s465_s19, %s466_s20  }
 0x133   :  { %462 = dma.done.wait [#allocation4], 2048  }
 0x134   :  { %463 = vsyncadd [#allocation4], 4294965248 }
 0x135   :  { %248 = vsyncpa [#allocation3], 1 }
 0x136   :  { %249 = vsyncpa [#allocation6], 1 }
 0x137   :  { %250 = vsyncpa [#allocation4], 1 }

</bundles_post_ra>
